<compile_context>
chip_gen: v6e
topology: v6e:2x2x1
jax: 0.10.0
libtpu: 0.0.40
codegen_flags: <defaults>
</compile_context>

<pallas_src>
import functools

import jax
import jax.numpy as jnp
from jax.experimental import pallas as pl
from jax.experimental.pallas import tpu as pltpu


_LANE = 128          # lane width (last-dim tiling unit)
_TM_DEFAULT_CAP = 1024
_TK_CAP = 512
_TN_CAP = 512


def _round_up(x, m):
    return ((x + m - 1) // m) * m


def _pick_divisor_tile(dim_padded, cap):
    """Largest multiple of 128 that is <= cap and divides dim_padded."""
    if dim_padded <= cap:
        return dim_padded
    t = cap - cap % _LANE
    while t >= _LANE:
        if dim_padded % t == 0:
            return t
        t -= _LANE
    return _LANE


def _vmem_budget():
    """(vmem_limit_bytes, per-step tile byte budget), generation aware."""
    try:
        cap = pltpu.get_tpu_info().vmem_capacity_bytes
    except Exception:
        cap = 128 << 20  # v5e / v6e physical VMEM
    # ~64 MiB scoped limit on v5e/v6e (128 MiB physical), ~48 MiB on v7x (64 MiB).
    vmem_limit = min(64 << 20, (cap * 3) // 4)
    # Leave headroom for compiler-internal scratch.
    tile_budget = (vmem_limit * 3) // 4
    return int(vmem_limit), int(tile_budget)


def _tile_vmem_bytes(tm, tk, tn, in_bytes, out_bytes):
    h = 2 * tm * tk * in_bytes      # double-buffered H tile
    w = 2 * tk * tn * in_bytes      # double-buffered W tile
    bias = 2 * tn * 4               # double-buffered bias tile
    o = 2 * tm * tn * out_bytes     # double-buffered output tile
    acc = tm * tn * 4               # f32 accumulator scratch
    return h + w + bias + o + acc


def _prediction_head_kernel(h_ref, w_ref, b_ref, o_ref, acc_ref):
    # Grid: (M tiles, N tiles, K tiles); K (reduction) is last / "arbitrary".
    @pl.when(pl.program_id(2) == 0)
    def _init():
        acc_ref[...] = jnp.zeros_like(acc_ref)

    acc_ref[...] += jnp.dot(h_ref[...], w_ref[...],
                            preferred_element_type=jnp.float32)

    @pl.when(pl.program_id(2) == pl.num_programs(2) - 1)
    def _finalize():
        # Bias add + sigmoid in f32, cast only at the final store.
        y = acc_ref[...] + b_ref[...]
        o_ref[...] = jax.nn.sigmoid(y).astype(o_ref.dtype)


@functools.partial(jax.jit, static_argnames=("tile_m",))
def prediction_head(H, W, b, tile_m=None):
    """Y = sigmoid(H @ W + b).

    H: [..., D_in]   (any leading dims)
    W: [D_in, D_out]
    b: [D_out]
    returns [..., D_out]
    """
    *lead, d_in = H.shape
    d_out = W.shape[1]
    M = 1
    for s in lead:
        M *= s

    in_bytes = jnp.dtype(H.dtype).itemsize
    out_bytes = in_bytes
    # Sublane alignment: 8 rows for 4-byte dtypes, 16 for 2-byte, 32 for 1-byte.
    sub_align = 8 if in_bytes >= 4 else (16 if in_bytes == 2 else 32)

    # Zero-pad: M to sublane multiple; K and N to lane (128) multiples so the
    # output is lane-dense and K tiles never pull garbage into valid rows.
    Mp = _round_up(M, sub_align)
    Kp = _round_up(d_in, _LANE)
    Np = _round_up(d_out, _LANE)

    H2 = H.reshape(M, d_in)
    if (Mp, Kp) != (M, d_in):
        H2 = jnp.pad(H2, ((0, Mp - M), (0, Kp - d_in)))
    W2 = W
    if (Kp, Np) != (d_in, d_out):
        W2 = jnp.pad(W2, ((0, Kp - d_in), (0, Np - d_out)))
    b2 = b.reshape(1, d_out)
    if Np != d_out:
        b2 = jnp.pad(b2, ((0, 0), (0, Np - d_out)))

    # K / N tiles: multiples of 128 that exactly divide the padded dims.
    tk = _pick_divisor_tile(Kp, _TK_CAP)
    tn = _pick_divisor_tile(Np, _TN_CAP)

    vmem_limit, tile_budget = _vmem_budget()

    # M tile: capped, sublane-aligned, shrunk until it fits the VMEM budget.
    if tile_m is not None:
        tm = max(sub_align, min(_round_up(int(tile_m), sub_align), Mp))
    else:
        tm = min(_TM_DEFAULT_CAP, Mp)
        tm = max(sub_align, tm - tm % sub_align)
        while (tm > sub_align and
               _tile_vmem_bytes(tm, tk, tn, in_bytes, out_bytes) > tile_budget):
            tm -= sub_align

    grid = (pl.cdiv(Mp, tm), Np // tn, Kp // tk)

    out = pl.pallas_call(
        _prediction_head_kernel,
        out_shape=jax.ShapeDtypeStruct((Mp, Np), H.dtype),
        grid_spec=pltpu.PrefetchScalarGridSpec(
            num_scalar_prefetch=0,
            grid=grid,
            in_specs=[
                pl.BlockSpec((tm, tk), lambda i, j, k: (i, k)),   # H tile
                pl.BlockSpec((tk, tn), lambda i, j, k: (k, j)),   # W tile
                pl.BlockSpec((1, tn), lambda i, j, k: (0, j)),    # bias tile
            ],
            out_specs=pl.BlockSpec((tm, tn), lambda i, j, k: (i, j)),
            scratch_shapes=[pltpu.VMEM((tm, tn), jnp.float32)],
        ),
        compiler_params=pltpu.CompilerParams(
            dimension_semantics=("parallel", "parallel", "arbitrary"),
            vmem_limit_bytes=vmem_limit,
        ),
    )(H2, W2, b2)

    out = out[:M, :d_out]
    return out.reshape(*lead, d_out)


if __name__ == "__main__":
    # Small, deterministic example consistent with the module's forward:
    # H: [batch, seq, input_dim] -> Y: [batch, seq, output_dim]
    batch, seq, input_dim, output_dim = 2, 8, 32, 4

    key = jax.random.PRNGKey(0)
    k_h, k_w, k_b = jax.random.split(key, 3)

    H = jax.random.normal(k_h, (batch, seq, input_dim), dtype=jnp.float32)

    # Deterministic "init" mimicking nn.Linear's uniform(-1/sqrt(fan_in), ...).
    bound = 1.0 / (input_dim ** 0.5)
    # PyTorch stores weight as [out, in]; keep that convention, then transpose.
    W_torch_layout = jax.random.uniform(
        k_w, (output_dim, input_dim), minval=-bound, maxval=bound,
        dtype=jnp.float32)
    b = jax.random.uniform(
        k_b, (output_dim,), minval=-bound, maxval=bound, dtype=jnp.float32)
    W = W_torch_layout.T  # [D_in, D_out]

    Y = prediction_head(H, W, b)
    Y = jax.block_until_ready(Y)

    # Pure-JAX reference check.
    Y_ref = jax.nn.sigmoid(jnp.einsum("bsd,do->bso", H, W) + b)
    assert Y.shape == (batch, seq, output_dim)
    assert jnp.allclose(Y, Y_ref, atol=1e-5, rtol=1e-5)

    print("KERNEL_OK")
</pallas_src>

<mosaic_0001>
module attributes {stable_mosaic.version = 11 : i64} {
  func.func @_prediction_head_kernel(%arg0: i32, %arg1: i32, %arg2: i32, %arg3: memref<16x128xf32, #tpu.memory_space<vmem>>, %arg4: memref<128x128xf32, #tpu.memory_space<vmem>>, %arg5: memref<1x128xf32, #tpu.memory_space<vmem>>, %arg6: memref<16x128xf32, #tpu.memory_space<vmem>>, %arg7: memref<16x128xf32, #tpu.memory_space<vmem>>) attributes {dimension_semantics = [#tpu.dimension_semantics<parallel>, #tpu.dimension_semantics<parallel>, #tpu.dimension_semantics<arbitrary>], iteration_bounds = array<i64: 1, 1, 1>, scalar_prefetch = 0 : i64, scratch_operands = 1 : i64, tpu.core_type = #tpu.core_type<tc>, window_params = [{transform_indices = @transform_0, window_bounds = array<i64: 16, 128>}, {transform_indices = @transform_1, window_bounds = array<i64: 128, 128>}, {transform_indices = @transform_2, window_bounds = array<i64: 1, 128>}, {transform_indices = @transform_3, window_bounds = array<i64: 16, 128>}]} {
    %c0_i32 = arith.constant 0 : i32
    %0 = arith.cmpi eq, %arg2, %c0_i32 : i32
    %1 = arith.extui %0 : i1 to i32
    %c0_i32_0 = arith.constant 0 : i32
    %2 = arith.cmpi ne, %1, %c0_i32_0 : i32
    scf.if %2 {
      %cst_10 = arith.constant 0.000000e+00 : f32
      %12 = vector.broadcast %cst_10 : f32 to vector<16x128xf32>
      %c0_11 = arith.constant 0 : index
      %c0_12 = arith.constant 0 : index
      %13 = vector.load %arg7[%c0_11, %c0_12] : memref<16x128xf32, #tpu.memory_space<vmem>>, vector<16x128xf32>
      tpu.vector_store %arg7[%c0_11, %c0_12], %12 {strides = array<i32>} : memref<16x128xf32, #tpu.memory_space<vmem>>, vector<16x128xf32>,
    } else {
    }
    %c0 = arith.constant 0 : index
    %c0_1 = arith.constant 0 : index
    %3 = vector.load %arg7[%c0, %c0_1] : memref<16x128xf32, #tpu.memory_space<vmem>>, vector<16x128xf32>
    %c0_2 = arith.constant 0 : index
    %c0_3 = arith.constant 0 : index
    %4 = vector.load %arg3[%c0_2, %c0_3] : memref<16x128xf32, #tpu.memory_space<vmem>>, vector<16x128xf32>
    %c0_4 = arith.constant 0 : index
    %c0_5 = arith.constant 0 : index
    %5 = vector.load %arg4[%c0_4, %c0_5] : memref<128x128xf32, #tpu.memory_space<vmem>>, vector<128x128xf32>
    %cst = arith.constant dense<0.000000e+00> : vector<16x128xf32>
    %6 = tpu.matmul %4, %5, %cst {dimension_numbers = #tpu.dot_dimension_numbers<[1], [0], [0], [1], [0, 0, 1, 1], [], []>} : vector<16x128xf32>, vector<128x128xf32>, vector<16x128xf32> -> vector<16x128xf32>
    %7 = arith.addf %3, %6 : vector<16x128xf32>
    %c0_6 = arith.constant 0 : index
    %c0_7 = arith.constant 0 : index
    %8 = vector.load %arg7[%c0_6, %c0_7] : memref<16x128xf32, #tpu.memory_space<vmem>>, vector<16x128xf32>
    tpu.vector_store %arg7[%c0_6, %c0_7], %7 {strides = array<i32>} : memref<16x128xf32, #tpu.memory_space<vmem>>, vector<16x128xf32>,
    %c0_i32_8 = arith.constant 0 : i32
    %9 = arith.cmpi eq, %arg2, %c0_i32_8 : i32
    %10 = arith.extui %9 : i1 to i32
    %c0_i32_9 = arith.constant 0 : i32
    %11 = arith.cmpi ne, %10, %c0_i32_9 : i32
    scf.if %11 {
      %c0_10 = arith.constant 0 : index
      %c0_11 = arith.constant 0 : index
      %12 = vector.load %arg7[%c0_10, %c0_11] : memref<16x128xf32, #tpu.memory_space<vmem>>, vector<16x128xf32>
      %c0_12 = arith.constant 0 : index
      %c0_13 = arith.constant 0 : index
      %13 = vector.load %arg5[%c0_12, %c0_13] : memref<1x128xf32, #tpu.memory_space<vmem>>, vector<1x128xf32>
      %14 = vector.broadcast %13 : vector<1x128xf32> to vector<16x128xf32>
      %15 = arith.addf %12, %14 : vector<16x128xf32>
      %16 = arith.negf %15 : vector<16x128xf32>
      %17 = math.exp %16 : vector<16x128xf32>
      %cst_14 = arith.constant 1.000000e+00 : f32
      %18 = vector.broadcast %cst_14 : f32 to vector<16x128xf32>
      %19 = arith.addf %18, %17 : vector<16x128xf32>
      %20 = arith.divf %18, %19 : vector<16x128xf32>
      %c0_15 = arith.constant 0 : index
      %c0_16 = arith.constant 0 : index
      %21 = vector.load %arg6[%c0_15, %c0_16] : memref<16x128xf32, #tpu.memory_space<vmem>>, vector<16x128xf32>
      tpu.vector_store %arg6[%c0_15, %c0_16], %20 {strides = array<i32>} : memref<16x128xf32, #tpu.memory_space<vmem>>, vector<16x128xf32>,
    } else {
    }
    return
  }
  func.func @transform_0(%arg0: i32, %arg1: i32, %arg2: i32) -> (i32, i32) {
    %c0_i32 = arith.constant 0 : i32
    return %arg0, %arg2 : i32, i32
  }
  func.func @transform_1(%arg0: i32, %arg1: i32, %arg2: i32) -> (i32, i32) {
    %c0_i32 = arith.constant 0 : i32
    return %arg2, %arg1 : i32, i32
  }
  func.func @transform_2(%arg0: i32, %arg1: i32, %arg2: i32) -> (i32, i32) {
    %c0_i32 = arith.constant 0 : i32
    %c0_i32_0 = arith.constant 0 : i32
    return %c0_i32, %arg1 : i32, i32
  }
  func.func @transform_3(%arg0: i32, %arg1: i32, %arg2: i32) -> (i32, i32) {
    %c0_i32 = arith.constant 0 : i32
    return %arg0, %arg1 : i32, i32
  }
}

</mosaic_0001>

<bundles_post_ra>
// kernel: prediction_head.1
= control target key start
LH: loop header
LB: loop body
LE: loop exit
PB: predicated region body
PF: predicated region fallthrough
CT: control target
= control target key end

     0   :  { %s298_s1 = inlined_call_operand.vmem [shape: f32[128,128], index: 1, kind: input, shape index: {}]   ;;  %s299_s0 = inlined_call_operand.vmem [shape: f32[16,128], index: 0, kind: input, shape index: {}]   ;;  %s300_s2 = inlined_call_operand.vmem [shape: f32[1,128], index: 2, kind: input, shape index: {}]   ;;  %s301_s3 = inlined_call_operand.vmem [shape: f32[16,128], index: 3, kind: output, shape index: {}]  }
   0x1   :  { %v39_v0 = vld [vmem:[%s298_s1 + $0x78] sm:$0xff]  ;;  %v38_v1 = vld [vmem:[%s298_s1 + $0x70] sm:$0xff]  ;;  %v37_v2 = vld [vmem:[%s298_s1 + $0x68] sm:$0xff] }
   0x2   :  { %172 = vmatprep.subr.mxu0 %v39_v0  ;;  %v36_v3 = vld [vmem:[%s298_s1 + $0x60] sm:$0xff]  ;;  %v35_v5 = vld [vmem:[%s298_s1 + $0x58] sm:$0xff]  ;;  %v34_v6 = vld [vmem:[%s298_s1 + $0x50] sm:$0xff] }
   0x3   :  { %173 = vmatpush3.msra.mxu0 %v39_v0  ;;  %v22_v4 = vld [vmem:[%s299_s0] sm:$0xff]  ;;  %v33_v7 = vld [vmem:[%s298_s1 + $0x48] sm:$0xff]  ;;  %v31_v9 = vld [vmem:[%s298_s1 + $0x38] sm:$0xff] }
   0x4   :  { %174 = vmatprep.subr.mxu0 %v38_v1  ;;  %204 = vmatprep.mubr.f32.mxu0 %v22_v4  ;;  %v32_v8 = vld [vmem:[%s298_s1 + $0x40] sm:$0xff]  ;;  %v30_v10 = vld [vmem:[%s298_s1 + $0x30] sm:$0xff]  ;;  %v29_v11 = vld [vmem:[%s298_s1 + $0x28] sm:$0xff] }
   0x5   :  { %175 = vmatpush3.msra.mxu0 %v38_v1  ;;  %v28_v12 = vld [vmem:[%s298_s1 + $0x20] sm:$0xff]  ;;  %v27_v13 = vld [vmem:[%s298_s1 + $0x18] sm:$0xff]  ;;  %v26_v14 = vld [vmem:[%s298_s1 + $0x10] sm:$0xff] }
   0x6   :  { %176 = vmatprep.subr.mxu0 %v37_v2  ;;  %v25_v15 = vld [vmem:[%s298_s1 + $0x8] sm:$0xff]  ;;  %v24_v16 = vld [vmem:[%s298_s1] sm:$0xff] }
   0x7   :  { %177 = vmatpush3.msra.mxu0 %v37_v2  ;;  %v23_v17 = vld [vmem:[%s299_s0 + $0x8] sm:$0xff]  ;;  %v151_v18 = vld [vmem:[%s300_s2] ss:$0 sm:$0xff] }
   0x8   :  { %178 = vmatprep.subr.mxu0 %v36_v3 }
   0x9   :  { %179 = vmatpush3.msra.mxu0 %v36_v3 }
   0xa   :  { %180 = vmatprep.subr.mxu0 %v35_v5 }
   0xb   :  { %181 = vmatpush3.msra.mxu0 %v35_v5 }
   0xc   :  { %182 = vmatprep.subr.mxu0 %v34_v6 }
   0xd   :  { %183 = vmatpush3.msra.mxu0 %v34_v6 }
   0xe   :  { %184 = vmatprep.subr.mxu0 %v33_v7 }
   0xf   :  { %185 = vmatpush3.msra.mxu0 %v33_v7 }
  0x10   :  { %186 = vmatprep.subr.mxu0 %v32_v8 }
  0x11   :  { %187 = vmatpush3.msra.mxu0 %v32_v8 }
  0x12   :  { %188 = vmatprep.subr.mxu0 %v31_v9 }
  0x13   :  { %189 = vmatpush3.msra.mxu0 %v31_v9 }
  0x14   :  { %190 = vmatprep.subr.mxu0 %v30_v10 }
  0x15   :  { %191 = vmatpush3.msra.mxu0 %v30_v10 }
  0x16   :  { %192 = vmatprep.subr.mxu0 %v29_v11 }
  0x17   :  { %193 = vmatpush3.msra.mxu0 %v29_v11 }
  0x18   :  { %194 = vmatprep.subr.mxu0 %v28_v12 }
  0x19   :  { %195 = vmatpush3.msra.mxu0 %v28_v12 }
  0x1a   :  { %196 = vmatprep.subr.mxu0 %v27_v13 }
  0x1b   :  { %197 = vmatpush3.msra.mxu0 %v27_v13 }
  0x1c   :  { %198 = vmatprep.subr.mxu0 %v26_v14 }
  0x1d   :  { %199 = vmatpush3.msra.mxu0 %v26_v14 }
  0x1e   :  { %200 = vmatprep.subr.mxu0 %v25_v15 }
  0x1f   :  { %201 = vmatpush3.msra.mxu0 %v25_v15 }
  0x20   :  { %202 = vmatprep.subr.mxu0 %v24_v16 }
  0x21   :  { %203 = vmatpush3.msra.mxu0 %v24_v16 }
  0x22   :  { %205 = vmatmul.mubr.f32.vlgmr.msra.gmra.mxu0 %v23_v17 }
  0xe2   :  { %v206_v19 = vpop.f32.mrf.mxu0 }
  0xe3   :  { %v132_v20 = vadd.f32 %v206_v19, %v151_v18 }
  0xe4   :  { %v106_v21 = vpop.f32.mrf.mxu0 }
  0xe5   :  { %v153_v22 = vmul.f32 -1.442695, %v132_v20  ;;  %v131_v23 = vadd.f32 %v151_v18, %v106_v21 }
  0xe7   :  { %207 = vpow2.f32 %v153_v22  ;;  %v152_v24 = vmul.f32 -1.442695, %v131_v23 }
  0xe9   :  { %209 = vpow2.f32 %v152_v24 }
  0xf4   :  { %v208_v25 = vpop.eup %207 }
  0xf5   :  { %v140_v26 = vadd.f32 1.0, %v208_v25 }
  0xf6   :  { %v210_v27 = vpop.eup %209 }
  0xf7   :  { %211 = vrcp.f32 %v140_v26  ;;  %v139_v28 = vadd.f32 1.0, %v210_v27 }
  0xf9   :  { %213 = vrcp.f32 %v139_v28 }
 0x104   :  { %v212_v29 = vpop.eup %211 }
 0x105   :  { %146 = vst [vmem:[%s301_s3 + $0x8] sm:$0xff] %v212_v29 }
 0x106   :  { %v214_v30 = vpop.eup %213 }
 0x107   :  { %145 = vst [vmem:[%s301_s3] sm:$0xff] %v214_v30 }

</bundles_post_ra>
